<compile_context>
chip_gen: v7x
topology: tpu7x:2x2x1
jax: 0.10.0
libtpu: 0.0.40
codegen_flags: <defaults>
</compile_context>

<pallas_src>
import jax
import jax.numpy as jnp
from jax.experimental import pallas as pl
from jax.experimental.pallas import tpu as pltpu

SMOOTH = 0.001
_LANE = 128
_SUB_F32 = 8                      # f32 sublane packing factor
_TARGET_TILE_BYTES = 4 << 20      # ~4 MiB per input tile
_VMEM_CAP = 48 << 20              # stay well under v7x's 64 MiB physical VMEM


def _dice_loss_kernel(pred_ref, targ_ref, loss_ref, inter_acc, union_acc):
    l = pl.program_id(1)
    nl = pl.num_programs(1)

    @pl.when(l == 0)
    def _():
        inter_acc[...] = jnp.zeros_like(inter_acc)
        union_acc[...] = jnp.zeros_like(union_acc)

    # Cast per-tile; the DMA/VALU balance absorbs it (kernel is HBM-bound).
    p = pred_ref[...].astype(jnp.float32)     # (B_BLK, L_BLK)
    t = targ_ref[...].astype(jnp.float32)

    inter_acc[...] += jnp.sum(p * t, axis=1, keepdims=True)
    union_acc[...] += jnp.sum(p + t, axis=1, keepdims=True)   # one reduce, not two

    @pl.when(l == nl - 1)
    def _():
        dice = (2.0 * inter_acc[...] + SMOOTH) / (union_acc[...] + SMOOTH)
        loss_ref[...] = 1.0 - dice


def _choose_blocks(n, hw, itemsize, target_tile_bytes):
    """Pick (b_blk, l_blk, n_pad, hw_pad), avoiding padding whenever legal."""
    sub = _SUB_F32
    row_bytes = hw * itemsize

    if sub * row_bytes <= target_tile_bytes:
        # A block spans the full flattened spatial axis.  "block dim == full
        # array dim" is always layout-legal, so no lane padding is needed even
        # when hw % 128 != 0.
        l_blk = hw
        b_fit = max(sub, (target_tile_bytes // row_bytes) // sub * sub)
        if n <= b_fit:
            # Single batch block equal to the full batch dim: no padding at all.
            return n, l_blk, n, hw
        # Multiple batch blocks (>= 2 since n > b_fit): b_blk must be a
        # multiple of 8; prefer one that divides n exactly (no pad copy).
        b_blk = b_fit
        for cand in range(b_fit, sub - 1, -sub):
            if n % cand == 0:
                b_blk = cand
                break
        n_pad = pl.cdiv(n, b_blk) * b_blk
        return b_blk, l_blk, n_pad, hw

    # Very long rows: split the spatial axis into near-equal 128-multiple
    # chunks derived from hw (minimal lane padding), batch axis in 8-row
    # blocks (or the full batch dim if n < 8).
    b_blk = n if n < sub else sub
    hw_lanes = pl.cdiv(hw, _LANE)
    max_lanes = max(1, (target_tile_bytes // (b_blk * itemsize)) // _LANE)
    n_chunks = pl.cdiv(hw_lanes, max_lanes)
    lanes_per_chunk = pl.cdiv(hw_lanes, n_chunks)
    l_blk = lanes_per_chunk * _LANE
    hw_pad = l_blk * n_chunks
    n_pad = pl.cdiv(n, b_blk) * b_blk
    return b_blk, l_blk, n_pad, hw_pad


def dice_loss(pred: jax.Array, target: jax.Array,
              *, target_tile_bytes: int = _TARGET_TILE_BYTES) -> jax.Array:
    """Pallas implementation of DiceLoss.forward(pred, target).

    pred, target: (N, H, W) arrays (0/1 masks, or soft maps for pred).
    Returns a scalar float32 loss.
    """
    assert pred.shape == target.shape and pred.ndim == 3
    n, h, w = pred.shape
    hw = h * w
    # f32 accumulation of 0/1 counts is exact up to 2^24 elements per sample.
    assert hw < (1 << 24), "H*W too large for exact f32 accumulation"

    if target.dtype != pred.dtype:
        target = target.astype(pred.dtype)
    itemsize = jnp.dtype(pred.dtype).itemsize

    b_blk, l_blk, n_pad, hw_pad = _choose_blocks(n, hw, itemsize, target_tile_bytes)

    def _prep(x):
        x = x.reshape(n, hw)                       # free: no data movement
        if (n_pad != n) or (hw_pad != hw):
            # Zero padding in BOTH pred and target is neutral for inter/union.
            # Only taken when the chosen blocking genuinely requires it.
            x = jnp.pad(x, ((0, n_pad - n), (0, hw_pad - hw)))
        return x

    p2 = _prep(pred)
    t2 = _prep(target)

    tile_bytes = b_blk * l_blk * itemsize
    # 2 inputs x 2 pipeline buffers x tile + headroom for outputs/scratch.
    vmem_limit = int(min(_VMEM_CAP, max(8 << 20, 4 * tile_bytes + (4 << 20))))

    per_sample = pl.pallas_call(
        _dice_loss_kernel,
        out_shape=jax.ShapeDtypeStruct((n_pad, 1), jnp.float32),
        grid_spec=pltpu.PrefetchScalarGridSpec(
            num_scalar_prefetch=0,
            grid=(n_pad // b_blk, hw_pad // l_blk),
            in_specs=[
                pl.BlockSpec((b_blk, l_blk), lambda b, l: (b, l)),
                pl.BlockSpec((b_blk, l_blk), lambda b, l: (b, l)),
            ],
            out_specs=pl.BlockSpec((b_blk, 1), lambda b, l: (b, 0)),
            scratch_shapes=[
                pltpu.VMEM((b_blk, 1), jnp.float32),   # per-sample inter acc
                pltpu.VMEM((b_blk, 1), jnp.float32),   # per-sample union acc
            ],
        ),
        compiler_params=pltpu.CompilerParams(
            dimension_semantics=("parallel", "arbitrary"),
            vmem_limit_bytes=vmem_limit,
        ),
    )(p2, t2)

    # Tiny final reduction; padded batch rows must stay excluded.
    return jnp.mean(per_sample[:n, 0])


def dice_loss_ref(pred, target):
    """Pure-JAX reference mirroring the PyTorch module."""
    pred = pred.astype(jnp.float32)
    target = target.astype(jnp.float32)
    inter = jnp.sum(pred * target, axis=(1, 2))
    union = jnp.sum(pred, axis=(1, 2)) + jnp.sum(target, axis=(1, 2))
    dice = (2.0 * inter + SMOOTH) / (union + SMOOTH)
    return jnp.mean(1.0 - dice)


if __name__ == "__main__":
    key = jax.random.PRNGKey(0)
    k1, k2, k3, k4, k5, k6 = jax.random.split(key, 6)

    # Case 1: canonical small binary-mask shape (single full-array block,
    # zero padding, zero wrapper copies).
    N, H, W = 2, 16, 16
    pred = (jax.random.uniform(k1, (N, H, W)) > 0.5).astype(jnp.float32)
    target = (jax.random.uniform(k2, (N, H, W)) > 0.5).astype(jnp.float32)
    loss = dice_loss(pred, target)
    jax.block_until_ready(loss)
    ref = dice_loss_ref(pred, target)
    assert jnp.allclose(loss, ref, rtol=1e-5, atol=1e-6), (loss, ref)

    # Case 2: odd batch and H*W not a multiple of 128 — still a single
    # full-array block, so no padding copy is materialized.
    N2, H2, W2 = 3, 20, 20
    pred2 = (jax.random.uniform(k3, (N2, H2, W2)) > 0.5).astype(jnp.float32)
    target2 = (jax.random.uniform(k4, (N2, H2, W2)) > 0.5).astype(jnp.float32)
    loss2 = dice_loss(pred2, target2)
    jax.block_until_ready(loss2)
    ref2 = dice_loss_ref(pred2, target2)
    assert jnp.allclose(loss2, ref2, rtol=1e-5, atol=1e-6), (loss2, ref2)

    # Case 3: force a tiny tile budget to exercise the multi-block batch
    # ("parallel") axis and the streaming spatial reduction: grid = (2, 2),
    # no padding needed.
    N3, H3, W3 = 16, 16, 16
    pred3 = (jax.random.uniform(k5, (N3, H3, W3)) > 0.5).astype(jnp.float32)
    target3 = (jax.random.uniform(k6, (N3, H3, W3)) > 0.5).astype(jnp.float32)
    loss3 = dice_loss(pred3, target3, target_tile_bytes=4096)
    jax.block_until_ready(loss3)
    ref3 = dice_loss_ref(pred3, target3)
    assert jnp.allclose(loss3, ref3, rtol=1e-5, atol=1e-6), (loss3, ref3)

    # Case 4: tiny tile budget + non-128-multiple H*W -> split spatial axis
    # with minimal lane padding (pad path exercised).
    loss4 = dice_loss(pred2, target2, target_tile_bytes=4096)
    jax.block_until_ready(loss4)
    assert jnp.allclose(loss4, ref2, rtol=1e-5, atol=1e-6), (loss4, ref2)

    print("KERNEL_OK")
</pallas_src>

<mosaic_0001>
module attributes {stable_mosaic.version = 11 : i64} {
  func.func @_dice_loss_kernel(%arg0: i32, %arg1: i32, %arg2: memref<2x256xf32, #tpu.memory_space<vmem>>, %arg3: memref<2x256xf32, #tpu.memory_space<vmem>>, %arg4: memref<2x1xf32, #tpu.memory_space<vmem>>, %arg5: memref<2x1xf32, #tpu.memory_space<vmem>>, %arg6: memref<2x1xf32, #tpu.memory_space<vmem>>) attributes {dimension_semantics = [#tpu.dimension_semantics<parallel>, #tpu.dimension_semantics<arbitrary>], iteration_bounds = array<i64: 1, 1>, scalar_prefetch = 0 : i64, scratch_operands = 2 : i64, tpu.core_type = #tpu.core_type<tc>, window_params = [{transform_indices = @transform_0, window_bounds = array<i64: 2, 256>}, {transform_indices = @transform_1, window_bounds = array<i64: 2, 256>}, {transform_indices = @transform_2, window_bounds = array<i64: 2, 1>}]} {
    %c0_i32 = arith.constant 0 : i32
    %0 = arith.cmpi eq, %arg1, %c0_i32 : i32
    %1 = arith.extui %0 : i1 to i32
    %c0_i32_0 = arith.constant 0 : i32
    %2 = arith.cmpi ne, %1, %c0_i32_0 : i32
    scf.if %2 {
      %cst_15 = arith.constant 0.000000e+00 : f32
      %20 = vector.broadcast %cst_15 : f32 to vector<2x1xf32>
      %c0_16 = arith.constant 0 : index
      %c0_17 = arith.constant 0 : index
      %21 = vector.load %arg5[%c0_16, %c0_17] : memref<2x1xf32, #tpu.memory_space<vmem>>, vector<2x1xf32>
      tpu.vector_store %arg5[%c0_16, %c0_17], %20 {strides = array<i32>} : memref<2x1xf32, #tpu.memory_space<vmem>>, vector<2x1xf32>,
      %cst_18 = arith.constant 0.000000e+00 : f32
      %22 = vector.broadcast %cst_18 : f32 to vector<2x1xf32>
      %c0_19 = arith.constant 0 : index
      %c0_20 = arith.constant 0 : index
      %23 = vector.load %arg6[%c0_19, %c0_20] : memref<2x1xf32, #tpu.memory_space<vmem>>, vector<2x1xf32>
      tpu.vector_store %arg6[%c0_19, %c0_20], %22 {strides = array<i32>} : memref<2x1xf32, #tpu.memory_space<vmem>>, vector<2x1xf32>,
    } else {
    }
    %c0 = arith.constant 0 : index
    %c0_1 = arith.constant 0 : index
    %3 = vector.load %arg2[%c0, %c0_1] : memref<2x256xf32, #tpu.memory_space<vmem>>, vector<2x256xf32>
    %c0_2 = arith.constant 0 : index
    %c0_3 = arith.constant 0 : index
    %4 = vector.load %arg3[%c0_2, %c0_3] : memref<2x256xf32, #tpu.memory_space<vmem>>, vector<2x256xf32>
    %c0_4 = arith.constant 0 : index
    %c0_5 = arith.constant 0 : index
    %5 = vector.load %arg5[%c0_4, %c0_5] : memref<2x1xf32, #tpu.memory_space<vmem>>, vector<2x1xf32>
    %6 = arith.mulf %3, %4 : vector<2x256xf32>
    %cst = arith.constant dense<0.000000e+00> : vector<2xf32>
    %7 = vector.multi_reduction <add>, %6, %cst [1] : vector<2x256xf32> to vector<2xf32>
    %8 = vector.shape_cast %7 : vector<2xf32> to vector<2x1xf32>
    %9 = arith.addf %5, %8 : vector<2x1xf32>
    %c0_6 = arith.constant 0 : index
    %c0_7 = arith.constant 0 : index
    %10 = vector.load %arg5[%c0_6, %c0_7] : memref<2x1xf32, #tpu.memory_space<vmem>>, vector<2x1xf32>
    tpu.vector_store %arg5[%c0_6, %c0_7], %9 {strides = array<i32>} : memref<2x1xf32, #tpu.memory_space<vmem>>, vector<2x1xf32>,
    %c0_8 = arith.constant 0 : index
    %c0_9 = arith.constant 0 : index
    %11 = vector.load %arg6[%c0_8, %c0_9] : memref<2x1xf32, #tpu.memory_space<vmem>>, vector<2x1xf32>
    %12 = arith.addf %3, %4 : vector<2x256xf32>
    %cst_10 = arith.constant dense<0.000000e+00> : vector<2xf32>
    %13 = vector.multi_reduction <add>, %12, %cst_10 [1] : vector<2x256xf32> to vector<2xf32>
    %14 = vector.shape_cast %13 : vector<2xf32> to vector<2x1xf32>
    %15 = arith.addf %11, %14 : vector<2x1xf32>
    %c0_11 = arith.constant 0 : index
    %c0_12 = arith.constant 0 : index
    %16 = vector.load %arg6[%c0_11, %c0_12] : memref<2x1xf32, #tpu.memory_space<vmem>>, vector<2x1xf32>
    tpu.vector_store %arg6[%c0_11, %c0_12], %15 {strides = array<i32>} : memref<2x1xf32, #tpu.memory_space<vmem>>, vector<2x1xf32>,
    %c0_i32_13 = arith.constant 0 : i32
    %17 = arith.cmpi eq, %arg1, %c0_i32_13 : i32
    %18 = arith.extui %17 : i1 to i32
    %c0_i32_14 = arith.constant 0 : i32
    %19 = arith.cmpi ne, %18, %c0_i32_14 : i32
    scf.if %19 {
      %c0_15 = arith.constant 0 : index
      %c0_16 = arith.constant 0 : index
      %20 = vector.load %arg5[%c0_15, %c0_16] : memref<2x1xf32, #tpu.memory_space<vmem>>, vector<2x1xf32>
      %cst_17 = arith.constant 2.000000e+00 : f32
      %21 = vector.broadcast %cst_17 : f32 to vector<2x1xf32>
      %22 = arith.mulf %21, %20 : vector<2x1xf32>
      %cst_18 = arith.constant 1.000000e-03 : f32
      %23 = vector.broadcast %cst_18 : f32 to vector<2x1xf32>
      %24 = arith.addf %22, %23 : vector<2x1xf32>
      %c0_19 = arith.constant 0 : index
      %c0_20 = arith.constant 0 : index
      %25 = vector.load %arg6[%c0_19, %c0_20] : memref<2x1xf32, #tpu.memory_space<vmem>>, vector<2x1xf32>
      %cst_21 = arith.constant 1.000000e-03 : f32
      %26 = vector.broadcast %cst_21 : f32 to vector<2x1xf32>
      %27 = arith.addf %25, %26 : vector<2x1xf32>
      %28 = arith.divf %24, %27 : vector<2x1xf32>
      %cst_22 = arith.constant 1.000000e+00 : f32
      %29 = vector.broadcast %cst_22 : f32 to vector<2x1xf32>
      %30 = arith.subf %29, %28 : vector<2x1xf32>
      %c0_23 = arith.constant 0 : index
      %c0_24 = arith.constant 0 : index
      %31 = vector.load %arg4[%c0_23, %c0_24] : memref<2x1xf32, #tpu.memory_space<vmem>>, vector<2x1xf32>
      tpu.vector_store %arg4[%c0_23, %c0_24], %30 {strides = array<i32>} : memref<2x1xf32, #tpu.memory_space<vmem>>, vector<2x1xf32>,
    } else {
    }
    return
  }
  func.func @transform_0(%arg0: i32, %arg1: i32) -> (i32, i32) {
    %c0_i32 = arith.constant 0 : i32
    return %arg0, %arg1 : i32, i32
  }
  func.func @transform_1(%arg0: i32, %arg1: i32) -> (i32, i32) {
    %c0_i32 = arith.constant 0 : i32
    return %arg0, %arg1 : i32, i32
  }
  func.func @transform_2(%arg0: i32, %arg1: i32) -> (i32, i32) {
    %c0_i32 = arith.constant 0 : i32
    %c0_i32_0 = arith.constant 0 : i32
    return %arg0, %c0_i32 : i32, i32
  }
}

</mosaic_0001>

<bundles_post_ra>
// kernel: tpu_custom_call.1
= control target key start
LH: loop header
LB: loop body
LE: loop exit
PB: predicated region body
PF: predicated region fallthrough
CT: control target
= control target key end

     0   :  { %7 = vsyncpa [#allocation5], 0  ;;  %s209_s0 = inlined_call_operand.hbm [shape: f32[2,256], index: 0, kind: input, shape index: {}]   ;;  %s210_s1 = inlined_call_operand.hbm [shape: f32[2,256], index: 1, kind: input, shape index: {}]   ;;  %s211_s2 = inlined_call_operand.vmem [shape: f32[2,1], index: 2, kind: output, shape index: {}]  }
   0x1   :  { %8 = vsyncpa [#allocation7], 0  ;;  %s158_s9 = smov [#allocation4]   ;;  %s159_s11 = smov [#allocation6]  }
   0x2   :  { %s15_s10 = sshll.u32 %s158_s9, 4  ;;  %s25_s12 = sshll.u32 %s159_s11, 4  ;;  %s16_s10 = int_to_ptr.vmem [resolvable:$true] %s15_s10  ;;  %s26_s12 = int_to_ptr.vmem [resolvable:$true] %s25_s12 }
   0x3   :  { %s110_s15 = scalar_lea.hbm %s209_s0, 64 }
   0x4   :  { %p111_p0 = scmp.ne.s32.totalorder %s209_s0, %s110_s15  ;;  %p114_p1 = scmp.lt.u32.totalorder %s110_s15, %s209_s0 }
   0x6   :  { %p116_p2 = pnand %p114_p1, %p111_p0 }
   0x8   :  { %119 = shalt.err (!%p116_p2)
}
   0x9   :  { %s120_s20 = scalar_lea.vmem %s16_s10, 64  ;;  %p125_p4 = scmp.lt.s32.totalorder %s16_s10, %s16_s10 }
   0xa   :  { %p121_p3 = scmp.ne.s32.totalorder %s16_s10, %s120_s20  ;;  %p126_p5 = scmp.lt.s32.totalorder %s120_s20, %s120_s20 }
   0xc   :  { %p127_p6 = por %p126_p5, %p125_p4 }
   0xe   :  { %p128_p7 = pnand %p127_p6, %p121_p3 }
  0x10   :  { %131 = shalt.err (!%p128_p7)
}
  0x11   :  { %18 = dma.hbm_to_vmem [thread:$0]  %s209_s0, 64, %s16_s10, [#allocation5]  }
  0x12   :  { %s132_s25 = scalar_lea.hbm %s210_s1, 64 }
  0x13   :  { %p133_p8 = scmp.ne.s32.totalorder %s210_s1, %s132_s25  ;;  %p136_p9 = scmp.lt.u32.totalorder %s132_s25, %s210_s1 }
  0x15   :  { %p138_p10 = pnand %p136_p9, %p133_p8 }
  0x17   :  { %141 = shalt.err (!%p138_p10)
}
  0x18   :  { %s142_s30 = scalar_lea.vmem %s26_s12, 64  ;;  %p147_p12 = scmp.lt.s32.totalorder %s26_s12, %s26_s12 }
  0x19   :  { %p143_p11 = scmp.ne.s32.totalorder %s26_s12, %s142_s30  ;;  %p148_p13 = scmp.lt.s32.totalorder %s142_s30, %s142_s30 }
  0x1b   :  { %p149_p0 = por %p148_p13, %p147_p12 }
  0x1d   :  { %p150_p1 = pnand %p149_p0, %p143_p11 }
  0x1f   :  { %153 = shalt.err (!%p150_p1)
}
  0x20   :  { %28 = dma.hbm_to_vmem [thread:$0]  %s210_s1, 64, %s26_s12, [#allocation7]  }
  0x21   :  { %154 = dma.done.wait [#allocation5], 64  }
  0x22   :  { %155 = vsyncadd [#allocation5], 4294967232 }
  0x23   :  { %156 = dma.done.wait [#allocation7], 64  }
  0x24   :  { %157 = vsyncadd [#allocation7], 4294967232  ;;  %v50_v0 = vlaneseq  ;;  %vm39_vm0 = vcmask 1024   ;;  %v160_v1 = vmov 1983009808   ;;  %v161_v4 = vmov 0.0  }
  0x25   :  { %v48_v2 = vunpack.c.l.s4 %v160_v1  ;;  %41 = vst.msk [vmem:[#allocation3] sm:$0x3] %vm39_vm0, %v161_v4  ;;  %40 = vst.msk [vmem:[#allocation2] sm:$0x3] %vm39_vm0, %v161_v4  ;;  %v42_v7 = vld [vmem:[#allocation4] sm:$0xf] }
  0x26   :  { %v51_v3 = vshrl.u32 %v50_v0, 7  ;;  %v43_v8 = vld [vmem:[#allocation6] sm:$0xf]  ;;  %vm57_vm1 = vcmask 1041408  }
  0x27   :  { %v49_v5 = vunpack.c.0.s8 %v48_v2  ;;  %v67_v9 = vadd.f32 %v43_v8, %v42_v7  ;;  %v45_v10 = vmul.f32 %v43_v8, %v42_v7 }
  0x29   :  { %v52_v6 = vsub.s32 %v49_v5, %v51_v3 }
  0x2b   :  { %v75_v11 = vrot.slane %v67_v9, %v52_v6  ;;  %v53_v12 = vrot.slane %v45_v10, %v52_v6 }
  0x2c   :  { %v66_v21 = vld [vmem:[#allocation3] sm:$0x3]  ;;  %v44_v24 = vld [vmem:[#allocation2] sm:$0x3] }
  0x2d   :  { %v76_v13 = vcombine.high %v75_v11, %v75_v11  ;;  %v79_v14 = vsel %vm57_vm1, %v75_v11, 0.0  ;;  %v54_v15 = vcombine.high %v53_v12, %v53_v12  ;;  %v58_v17 = vsel %vm57_vm1, %v53_v12, 0.0 }
  0x2f   :  { %v80_v16 = vsel %vm57_vm1, %v76_v13, 0.0  ;;  %v59_v18 = vsel %vm57_vm1, %v54_v15, 0.0 }
  0x30   :  { %v81_v19 = vadd.f32 %v80_v16, %v79_v14  ;;  %v60_v20 = vadd.f32 %v59_v18, %v58_v17 }
  0x32   :  { %82 = vadd.xlane.f32.xlu0 %v81_v19 }
  0x36   :  { %61 = vadd.xlane.f32.xlu0 %v60_v20 }
  0xbf   :  { %v83_v22 = vpop.xlane.xlu0 %82 }
  0xc0   :  { %v84_v23 = vadd.f32 %v83_v22, %v66_v21 }
  0xc2   :  { %85 = vst.msk [vmem:[#allocation3] sm:$0x3] %vm39_vm0, %v84_v23 }
  0xc3   :  { %v62_v25 = vpop.xlane.xlu0 %61 }
  0xc4   :  { %v63_v26 = vadd.f32 %v62_v25, %v44_v24 }
  0xc6   :  { %65 = vst.msk [vmem:[#allocation2] sm:$0x3] %vm39_vm0, %v63_v26 }
  0xc9   :  { %v92_v27 = vld [vmem:[#allocation3] sm:$0x3] }
  0xca   :  { %v93_v28 = vadd.f32 0.001, %v92_v27 }
  0xcc   :  { %108 = vrcp.f32 %v93_v28 }
  0xcd   :  { %v89_v29 = vld [vmem:[#allocation2] sm:$0x3] }
  0xce   :  { %v90_v30 = vmul.f32 2.0, %v89_v29 }
  0xd0   :  { %v91_v31 = vadd.f32 0.001, %v90_v30 }
  0xd6   :  { %v109_v32 = vpop.eup %108 }
  0xd7   :  { %v95_v33 = vmul.f32 %v109_v32, %v91_v31 }
  0xd9   :  { %v96_v34 = vsub.f32 1.0, %v95_v33 }
  0xdb   :  { %97 = vst.msk [vmem:[%s211_s2] sm:$0x3] %vm39_vm0, %v96_v34 }
  0xdc   :  { %102 = vsyncpa [#allocation5], 1 }
  0xdd   :  { %103 = vsyncpa [#allocation7], 1 }

</bundles_post_ra>
